<compile_context>
chip_gen: v5e
topology: v5e:2x2
jax: 0.10.0
libtpu: 0.0.40
codegen_flags: <defaults>
</compile_context>

<pallas_src>
import jax
import jax.numpy as jnp
from jax.experimental import pallas as pl
from jax.experimental.pallas import tpu as pltpu

# ---------------------------------------------------------------------------
# Model / quantization configuration (deterministic, defined in-script).
# ---------------------------------------------------------------------------
C_IN = 4          # input channels
C_OUT = 32        # output channels of the representative conv block
KH = KW = 3       # conv kernel size (stride 1, padding 1 -> same spatial size)

# Per-tensor affine quantization parameters (quint8), fixed deterministically.
S_IN, INV_S_IN = 1.0 / 64.0, 64.0     # QuantStub scale (zero_point = 128)
S_OUT, INV_S_OUT = 1.0 / 32.0, 32.0   # output requant scale (zero_point = 0)
S_W = 1.0 / 128.0                     # symmetric int8 weight scale
# ZP_IN = 128 is added then subtracted across quantize/dequantize and folds
# away exactly; ZP_OUT = 0 makes its add/subtract a no-op.


def qconv_kernel(x_ref, w_ref, b_ref, o_ref):
    """conv3x3 (one fused MXU matmul) -> bias -> ReLU -> requant -> dequant.

    x_ref : (K, TN)      bf16  QuantStub'd (dequantized-quint8) im2col columns
    w_ref : (C_OUT, K)   bf16  fake-quantized int8-grid conv weights
    b_ref : (C_OUT, 1)   f32   bias
    o_ref : (C_OUT, TN)  f32   lane-dense output tile
    """
    # Single MXU matmul; bf16 operands are lossless here (small integers times
    # power-of-two scales, accumulated in f32).
    acc = jnp.dot(w_ref[...], x_ref[...], preferred_element_type=jnp.float32)

    # bias + ReLU (bias broadcast along the lane-dense column axis).
    acc = jnp.maximum(acc + b_ref[...], 0.0)

    # Fused requantize-to-quint8 (zero_point 0) + DeQuantStub back to float32.
    o_ref[...] = jnp.clip(jnp.round(acc * INV_S_OUT), 0.0, 255.0) * S_OUT


def quantized_lprnet_forward(x_nchw, w_khkwcico, bias, *, col_tile=8192):
    """x_nchw: (N, C_in, H, W) float32, like the PyTorch module input."""
    n, c_in, h, w_dim = x_nchw.shape
    c_out = w_khkwcico.shape[-1]
    k_dim = KH * KW * c_in
    cols = n * h * w_dim

    # --- QuantStub, hoisted (element-wise, so commuting with im2col is exact).
    # quint8 quantize + dequantize with scale 1/64, zero_point 128, folded:
    #   dq = (clip(round(x*64)+128, 0, 255) - 128) / 64
    #      =  clip(round(x*64), -128, 127) / 64
    # Values are k/64 with integer |k| <= 128 -> exact in bf16.
    x_dq = (jnp.clip(jnp.round(x_nchw * INV_S_IN), -128.0, 127.0)
            * S_IN).astype(jnp.bfloat16)

    # --- glue: zero-pad spatially (conv padding=1), im2col directly in NCHW.
    x_pad = jnp.pad(x_dq, ((0, 0), (0, 0), (1, 1), (1, 1)))
    taps = [x_pad[:, :, kh:kh + h, kw:kw + w_dim]
            for kh in range(KH) for kw in range(KW)]            # 9 x (N,C,H,W)
    patches = jnp.stack(taps, axis=0)                           # (9,N,C,H,W)
    patches = jnp.transpose(patches, (0, 2, 1, 3, 4))           # (9,C,N,H,W)
    x2d = patches.reshape(k_dim, cols)                          # (K, cols) bf16

    # --- glue: weights -> (C_out, K) bf16 (exact: int8 grid * 1/128), so the
    #           kernel output is lane-dense; bias -> (C_out, 1) f32.
    w2d = jnp.transpose(w_khkwcico.reshape(k_dim, c_out)).astype(jnp.bfloat16)
    b2d = bias.reshape(c_out, 1).astype(jnp.float32)

    # Column tiling: one big lane-dense tile when everything fits (demo size
    # collapses to a single grid step); otherwise 8192-wide tiles (mult of 128).
    tn = min(col_tile, cols)
    n_tiles = pl.cdiv(cols, tn)
    cols_pad = n_tiles * tn
    if cols_pad != cols:
        x2d = jnp.pad(x2d, ((0, 0), (0, cols_pad - cols)))

    out2d = pl.pallas_call(
        qconv_kernel,
        out_shape=jax.ShapeDtypeStruct((c_out, cols_pad), jnp.float32),
        grid=(n_tiles,),
        in_specs=[
            pl.BlockSpec((k_dim, tn), lambda j: (0, j)),        # im2col tile
            pl.BlockSpec((c_out, k_dim), lambda j: (0, 0)),     # full weights
            pl.BlockSpec((c_out, 1), lambda j: (0, 0)),         # bias
        ],
        out_specs=pl.BlockSpec((c_out, tn), lambda j: (0, j)),
        compiler_params=pltpu.CompilerParams(
            dimension_semantics=("parallel",)),   # shards across TCs on v7x
    )(x2d, w2d, b2d)

    # --- glue: back to PyTorch NCHW layout (float32 DeQuantStub output).
    out = out2d[:, :cols].reshape(c_out, n, h, w_dim)
    return jnp.transpose(out, (1, 0, 2, 3))


if __name__ == "__main__":
    key = jax.random.PRNGKey(0)
    kx, kw, kb = jax.random.split(key, 3)

    # Small deterministic shapes: batch=2, channels=4, spatial=16x16 (NCHW).
    x = jax.random.normal(kx, (2, C_IN, 16, 16), dtype=jnp.float32)

    # Deterministic conv parameters; weights fake-quantized to the symmetric
    # int8 grid (what a converted quantized conv would hold).
    w_f = jax.random.normal(kw, (KH, KW, C_IN, C_OUT), dtype=jnp.float32) * 0.1
    w_q = jnp.clip(jnp.round(w_f / S_W), -128.0, 127.0) * S_W
    bias = jax.random.normal(kb, (C_OUT,), dtype=jnp.float32) * 0.05

    out = quantized_lprnet_forward(x, w_q, bias)
    jax.block_until_ready(out)

    assert out.shape == (2, C_OUT, 16, 16)
    assert out.dtype == jnp.float32
    # TODO(synk): the real inner `model` (full LPRNet backbone) is passed at
    # construction time in PyTorch and is not defined in the source file; a
    # representative conv+ReLU block is used here with exact quant/dequant
    # stub semantics.  Bias is added in f32 before requantization (PyTorch's
    # converted quantized conv adds an int32 bias in the integer accumulator),
    # so results may differ by up to half an output quantum vs PyTorch.
    print("KERNEL_OK")
</pallas_src>

<mosaic_0001>
module attributes {stable_mosaic.version = 11 : i64} {
  func.func @qconv_kernel(%arg0: i32, %arg1: memref<36x512xbf16, #tpu.memory_space<vmem>>, %arg2: memref<32x36xbf16, #tpu.memory_space<vmem>>, %arg3: memref<32x1xf32, #tpu.memory_space<vmem>>, %arg4: memref<32x512xf32, #tpu.memory_space<vmem>>) attributes {dimension_semantics = [#tpu.dimension_semantics<parallel>], iteration_bounds = array<i64: 1>, scalar_prefetch = 0 : i64, scratch_operands = 0 : i64, tpu.core_type = #tpu.core_type<tc>, window_params = [{transform_indices = @transform_0, window_bounds = array<i64: 36, 512>}, {pipeline_mode = #tpu.pipeline_mode<synchronous>, transform_indices = @transform_1, window_bounds = array<i64: 32, 36>}, {pipeline_mode = #tpu.pipeline_mode<synchronous>, transform_indices = @transform_2, window_bounds = array<i64: 32, 1>}, {transform_indices = @transform_3, window_bounds = array<i64: 32, 512>}]} {
    %c0 = arith.constant 0 : index
    %c0_0 = arith.constant 0 : index
    %0 = vector.load %arg2[%c0, %c0_0] : memref<32x36xbf16, #tpu.memory_space<vmem>>, vector<32x36xbf16>
    %c0_1 = arith.constant 0 : index
    %c0_2 = arith.constant 0 : index
    %1 = vector.load %arg1[%c0_1, %c0_2] : memref<36x512xbf16, #tpu.memory_space<vmem>>, vector<36x512xbf16>
    %cst = arith.constant dense<0.000000e+00> : vector<32x512xf32>
    %2 = tpu.matmul %0, %1, %cst {dimension_numbers = #tpu.dot_dimension_numbers<[1], [0], [0], [1], [0, 0, 1, 1], [], []>} : vector<32x36xbf16>, vector<36x512xbf16>, vector<32x512xf32> -> vector<32x512xf32>
    %c0_3 = arith.constant 0 : index
    %c0_4 = arith.constant 0 : index
    %3 = vector.load %arg3[%c0_3, %c0_4] : memref<32x1xf32, #tpu.memory_space<vmem>>, vector<32x1xf32>
    %4 = vector.broadcast %3 : vector<32x1xf32> to vector<32x512xf32>
    %5 = arith.addf %2, %4 : vector<32x512xf32>
    %cst_5 = arith.constant 0.000000e+00 : f32
    %6 = vector.broadcast %cst_5 : f32 to vector<32x512xf32>
    %7 = arith.maximumf %5, %6 : vector<32x512xf32>
    %cst_6 = arith.constant 3.200000e+01 : f32
    %8 = vector.broadcast %cst_6 : f32 to vector<32x512xf32>
    %9 = arith.mulf %7, %8 : vector<32x512xf32>
    %10 = math.roundeven %9 : vector<32x512xf32>
    %cst_7 = arith.constant 0.000000e+00 : f32
    %cst_8 = arith.constant 2.550000e+02 : f32
    %11 = vector.broadcast %cst_7 : f32 to vector<32x512xf32>
    %12 = arith.maximumf %11, %10 : vector<32x512xf32>
    %13 = vector.broadcast %cst_8 : f32 to vector<32x512xf32>
    %14 = arith.minimumf %13, %12 : vector<32x512xf32>
    %cst_9 = arith.constant 3.125000e-02 : f32
    %15 = vector.broadcast %cst_9 : f32 to vector<32x512xf32>
    %16 = arith.mulf %14, %15 : vector<32x512xf32>
    %c0_10 = arith.constant 0 : index
    %c0_11 = arith.constant 0 : index
    %17 = vector.load %arg4[%c0_10, %c0_11] : memref<32x512xf32, #tpu.memory_space<vmem>>, vector<32x512xf32>
    tpu.vector_store %arg4[%c0_10, %c0_11], %16 {strides = array<i32>} : memref<32x512xf32, #tpu.memory_space<vmem>>, vector<32x512xf32>,
    return
  }
  func.func @transform_0(%arg0: i32) -> (i32, i32) {
    %c0_i32 = arith.constant 0 : i32
    %c0_i32_0 = arith.constant 0 : i32
    return %c0_i32, %arg0 : i32, i32
  }
  func.func @transform_1(%arg0: i32) -> (i32, i32) {
    %c0_i32 = arith.constant 0 : i32
    %c0_i32_0 = arith.constant 0 : i32
    %c0_i32_1 = arith.constant 0 : i32
    return %c0_i32, %c0_i32_0 : i32, i32
  }
  func.func @transform_2(%arg0: i32) -> (i32, i32) {
    %c0_i32 = arith.constant 0 : i32
    %c0_i32_0 = arith.constant 0 : i32
    %c0_i32_1 = arith.constant 0 : i32
    return %c0_i32, %c0_i32_0 : i32, i32
  }
  func.func @transform_3(%arg0: i32) -> (i32, i32) {
    %c0_i32 = arith.constant 0 : i32
    %c0_i32_0 = arith.constant 0 : i32
    return %c0_i32, %arg0 : i32, i32
  }
}

</mosaic_0001>

<bundles_post_ra>
// kernel: tpu_custom_call.1
= control target key start
LH: loop header
LB: loop body
LE: loop exit
PB: predicated region body
PF: predicated region fallthrough
CT: control target
= control target key end

     0   :  { %8 = vsyncpa [#allocation3], 0  ;;  %s707_s0 = inlined_call_operand.hbm [shape: bf16[36,512], index: 0, kind: input, shape index: {}]   ;;  %s708_s1 = inlined_call_operand.vmem [shape: bf16[32,36], index: 1, kind: input, shape index: {}]   ;;  %s709_s2 = inlined_call_operand.vmem [shape: f32[32,1], index: 2, kind: input, shape index: {}]   ;;  %s710_s3 = inlined_call_operand.hbm [shape: f32[32,512], index: 3, kind: output, shape index: {}]  }
   0x1   :  { %9 = vsyncpa [#allocation4], 0  ;;  %s14_s14 = sshll.u32 %s707_s0, 4  ;;  %s604_s15 = smov [#allocation2]   ;;  %s15_s14 = int_to_ptr.hbm [resolvable:$true] %s14_s14 }
   0x2   :  { %s16_s16 = sshll.u32 %s604_s15, 4  ;;  %s605_s17 = smov 256   ;;  %s17_s16 = int_to_ptr.vmem [resolvable:$true] %s16_s16 }
   0x3   :  { %s606_s18 = smov 16  }
   0x4   :  { %22 = dma.hbm_to_vmem [thread:$0]  %s15_s14, 1280, %s17_s16, [#allocation3], %s605_s17, %s605_s17, %s606_s18  }
   0x5   :  { %600 = dma.done.wait [#allocation3], 1280  }
   0x6   :  { %601 = vsyncadd [#allocation3], 4294966016  ;;  %v607_v0 = vmov 0   ;;  %v44_v1 = vld [vmem:[#allocation2 + $0x40] sm:$0x33]  ;;  %vm137_vm0 = vcmask 1041408  }
   0x7   :  { %550 = vset.pattern.permute.xlu0 %v607_v0  ;;  %551 = vset.pattern.permute.xlu1 %v607_v0  ;;  %v45_v2 = vld [vmem:[#allocation2 + $0x48] sm:$0x33]  ;;  %v106_v3 = vunpack.c.l.b16 %v44_v1  ;;  %v107_v4 = vunpack.c.h.b16 %v44_v1  ;;  %v383_v7 = vld [vmem:[#allocation2 + $0x20] sm:$0xf]  ;;  %v413_v8 = vld [vmem:[#allocation2 + $0x2c] sm:$0xf0] }
   0x8   :  { %v108_v5 = vunpack.c.l.b16 %v45_v2  ;;  %v109_v6 = vunpack.c.h.b16 %v45_v2  ;;  %v411_v13 = vld [vmem:[#allocation2 + $0x24] sm:$0xf]  ;;  %v385_v14 = vld [vmem:[#allocation2 + $0x30] sm:$0xf0]  ;;  %v391_v15 = vld [vmem:[#allocation2 + $0x28] sm:$0xf]  ;;  %v384_v24 = vor.u32 %v413_v8, %v383_v7 }
   0x9   :  { %v118_v9 = vpack.c.b16 %v106_v3, %v106_v3  ;;  %v119_v10 = vpack.c.b16 %v107_v4, %v107_v4  ;;  %v414_v16 = vld [vmem:[#allocation2 + $0x34] sm:$0xf0]  ;;  %v412_v17 = vld [vmem:[#allocation2 + $0x2c] sm:$0xf]  ;;  %v393_v18 = vld [vmem:[#allocation2 + $0x38] sm:$0xf0]  ;;  %v388_v25 = vor.u32 %v411_v13, %v385_v14 }
   0xa   :  { %v120_v11 = vpack.c.b16 %v108_v5, %v108_v5  ;;  %v121_v12 = vpack.c.b16 %v109_v6, %v109_v6  ;;  %v367_v23 = vld [vmem:[#allocation2] sm:$0xf]  ;;  %v409_v26 = vld [vmem:[#allocation2 + $0xc] sm:$0xf0]  ;;  %v407_v27 = vld [vmem:[#allocation2 + $0x4] sm:$0xf]  ;;  %v392_v29 = vor.u32 %v414_v16, %v391_v15  ;;  %v396_v30 = vor.u32 %v412_v17, %v393_v18 }
   0xb   :  { %v139_v19 = vsel %vm137_vm0, %v118_v9, 0  ;;  %v142_v20 = vsel %vm137_vm0, %v119_v10, 0  ;;  %v369_v28 = vld [vmem:[#allocation2 + $0x10] sm:$0xf0]  ;;  %v375_v31 = vld [vmem:[#allocation2 + $0x8] sm:$0xf]  ;;  %v368_v37 = vor.u32 %v409_v26, %v367_v23 }
   0xc   :  { %v145_v21 = vsel %vm137_vm0, %v120_v11, 0  ;;  %v148_v22 = vsel %vm137_vm0, %v121_v12, 0  ;;  %155 = vmatpush.bf16.msra.mxu0 %v139_v19  ;;  %174 = vmatpush.bf16.msra.mxu1 %v142_v20  ;;  %v410_v32 = vld [vmem:[#allocation2 + $0x14] sm:$0xf0]  ;;  %v46_v33 = vld [vmem:[%s709_s2] sm:$0xff]  ;;  %v48_v36 = vld [vmem:[%s709_s2 + $0x10] sm:$0xff]  ;;  %v372_v38 = vor.u32 %v407_v27, %v369_v28 }
   0xd   :  { %193 = vmatpush.bf16.msra.mxu2 %v145_v21  ;;  %212 = vmatpush.bf16.msra.mxu3 %v148_v22  ;;  %v408_v34 = vld [vmem:[#allocation2 + $0xc] sm:$0xf]  ;;  %v377_v35 = vld [vmem:[#allocation2 + $0x18] sm:$0xf0]  ;;  %v376_v39 = vor.u32 %v410_v32, %v375_v31  ;;  %v405_v41 = vld [vmem:[%s708_s1] sm:$0xff]  ;;  %vm130_vm1 = vcmask 293888  }
   0xe   :  { %52 = vperm.xlu0 %550, %v46_v33   ;;  %62 = vperm.xlu1 %551, %v48_v36   ;;  %v380_v40 = vor.u32 %v408_v34, %v377_v35  ;;  %v47_v42 = vld [vmem:[%s709_s2 + $0x8] sm:$0xff]  ;;  %v49_v43 = vld [vmem:[%s709_s2 + $0x18] sm:$0xff]  ;;  %s344_s5 = sshll.u32 %s710_s3, 4  ;;  %s609_s6 = smov 512   ;;  %s345_s5 = int_to_ptr.hbm [resolvable:$true] %s344_s5 }
   0xf   :  { %v406_v44 = vld [vmem:[%s708_s1 + $0x8] sm:$0xff]  ;;  %s608_s1 = smov [#allocation5]   ;;  %s610_s7 = smov 32  }
  0x10   :  { %156 = vmatpush.bf16.msra.mxu0 %v384_v24  ;;  %175 = vmatpush.bf16.msra.mxu1 %v388_v25  ;;  %s342_s2 = sshll.u32 %s608_s1, 4  ;;  %s343_s2 = int_to_ptr.vmem [resolvable:$true] %s342_s2 }
  0x11   :  { %194 = vmatpush.bf16.msra.mxu2 %v392_v29  ;;  %213 = vmatpush.bf16.msra.mxu3 %v396_v30 }
  0x14   :  { %157 = vmatpush.bf16.msra.mxu0 %v368_v37  ;;  %176 = vmatpush.bf16.msra.mxu1 %v372_v38 }
  0x15   :  { %195 = vmatpush.bf16.msra.mxu2 %v376_v39  ;;  %214 = vmatpush.bf16.msra.mxu3 %v380_v40 }
  0x16   :  { %57 = vperm.xlu0 %550, %v47_v42   ;;  %67 = vperm.xlu1 %551, %v49_v43  }
  0x17   :  { %397 = vmatmul.msk.bf16.vlgmr.msra.gmra.mxu0 %vm130_vm1, %v405_v41  ;;  %399 = vmatmul.msk.bf16.vlgmr.msra.gmra.mxu1 %vm130_vm1, %v405_v41 }
  0x18   :  { %401 = vmatmul.msk.bf16.vlgmr.msra.gmra.mxu2 %vm130_vm1, %v405_v41  ;;  %403 = vmatmul.msk.bf16.vlgmr.msra.gmra.mxu3 %vm130_vm1, %v405_v41 }
  0x27   :  { %398 = vmatmul.msk.bf16.gmra.mxu0 %vm130_vm1, %v406_v44  ;;  %400 = vmatmul.msk.bf16.gmra.mxu1 %vm130_vm1, %v406_v44 }
  0x28   :  { %402 = vmatmul.msk.bf16.gmra.mxu2 %vm130_vm1, %v406_v44  ;;  %404 = vmatmul.msk.bf16.gmra.mxu3 %vm130_vm1, %v406_v44 }
  0x80   :  { %v53_v45 = vpop.permute.xlu0 %52 }
  0x88   :  { %v656_v54 = vpop.permute.xlu0 %57 }
  0x94   :  { %v159_v46 = vpop.f32.mrf.mxu0  ;;  %v178_v47 = vpop.f32.mrf.mxu1 }
  0x95   :  { %v160_v48 = vadd.f32 %v159_v46, %v53_v45  ;;  %v179_v49 = vadd.f32 %v178_v47, %v53_v45 }
  0x97   :  { %v226_v50 = vmax.f32 %v160_v48, 0.0  ;;  %v227_v51 = vmax.f32 %v179_v49, 0.0 }
  0x99   :  { %v242_v52 = vmul.f32 32.0, %v226_v50  ;;  %v243_v53 = vmul.f32 32.0, %v227_v51 }
  0x9b   :  { %v415_v55 = vand.u32 2147483647, %v242_v52  ;;  %v417_v56 = vcvt.f32.s32 %v242_v52  ;;  %v197_v57 = vpop.f32.mrf.mxu2  ;;  %v216_v58 = vpop.f32.mrf.mxu3  ;;  %v420_v59 = vand.u32 2147483648, %v242_v52  ;;  %v425_v60 = vcvt.f32.s32 %v243_v53 }
  0x9c   :  { %v198_v61 = vadd.f32 %v197_v57, %v53_v45  ;;  %v217_v62 = vadd.f32 %v216_v58, %v53_v45  ;;  %v161_v63 = vpop.f32.mrf.mxu0  ;;  %v180_v0 = vpop.f32.mrf.mxu1  ;;  %v423_v2 = vand.u32 2147483647, %v243_v53  ;;  %v428_v3 = vand.u32 2147483648, %v243_v53 }
  0x9d   :  { %v418_v1 = vcvt.s32.f32 %v417_v56  ;;  %v162_v4 = vadd.f32 %v161_v63, %v656_v54  ;;  %v426_v5 = vcvt.s32.f32 %v425_v60  ;;  %v181_v8 = vadd.f32 %v180_v0, %v656_v54  ;;  %v63_v63 = vpop.permute.xlu1 %62 }
  0x9e   :  { %v228_v6 = vmax.f32 %v198_v61, 0.0  ;;  %v229_v7 = vmax.f32 %v217_v62, 0.0  ;;  %vm416_vm2 = vcmp.lt.f32.partialorder %v415_v55, 8388608.0  ;;  %vm424_vm3 = vcmp.lt.f32.partialorder %v423_v2, 8388608.0 }
  0x9f   :  { %v419_v9 = vand.u32 2147483647, %v418_v1  ;;  %v230_v10 = vmax.f32 %v162_v4, 0.0  ;;  %v427_v11 = vand.u32 2147483647, %v426_v5  ;;  %v231_v19 = vmax.f32 %v181_v8, 0.0 }
  0xa0   :  { %v244_v12 = vmul.f32 32.0, %v228_v6  ;;  %v245_v13 = vmul.f32 32.0, %v229_v7 }
  0xa1   :  { %v421_v14 = vor.u32 %v420_v59, %v419_v9  ;;  %v246_v15 = vmul.f32 32.0, %v230_v10  ;;  %v429_v16 = vor.u32 %v428_v3, %v427_v11  ;;  %v247_v40 = vmul.f32 32.0, %v231_v19 }
  0xa2   :  { %v431_v17 = vand.u32 2147483647, %v244_v12  ;;  %v433_v18 = vcvt.f32.s32 %v244_v12  ;;  %v436_v21 = vand.u32 2147483648, %v244_v12  ;;  %v439_v22 = vand.u32 2147483647, %v245_v13 }
  0xa3   :  { %v422_v20 = vsel %vm416_vm2, %v421_v14, %v242_v52  ;;  %v441_v23 = vcvt.f32.s32 %v245_v13  ;;  %v430_v25 = vsel %vm424_vm3, %v429_v16, %v243_v53  ;;  %v444_v27 = vand.u32 2147483648, %v245_v13  ;;  %v199_v32 = vpop.f32.mrf.mxu2  ;;  %v218_v45 = vpop.f32.mrf.mxu3 }
  0xa4   :  { %v274_v24 = vmax.f32 %v422_v20, 0.0  ;;  %v434_v26 = vcvt.s32.f32 %v433_v18  ;;  %v275_v28 = vmax.f32 %v430_v25, 0.0  ;;  %vm660_vm4 = vcmp.lt.f32.partialorder %v431_v17, 8388608.0  ;;  %v164_v55 = vpop.f32.mrf.mxu0  ;;  %v183_v56 = vpop.f32.mrf.mxu1 }
  0xa5   :  { %v442_v30 = vcvt.s32.f32 %v441_v23  ;;  %v447_v31 = vand.u32 2147483647, %v246_v15  ;;  %vm664_vm5 = vcmp.lt.f32.partialorder %v439_v22, 8388608.0  ;;  %v449_v36 = vcvt.f32.s32 %v246_v15 }
  0xa6   :  { %v290_v33 = vmin.f32 %v274_v24, 255.0  ;;  %v435_v34 = vand.u32 2147483647, %v434_v26  ;;  %v291_v37 = vmin.f32 %v275_v28, 255.0  ;;  %v452_v39 = vand.u32 2147483648, %v246_v15 }
  0xa7   :  { %v443_v38 = vand.u32 2147483647, %v442_v30  ;;  %v450_v43 = vcvt.s32.f32 %v449_v36  ;;  %v200_v44 = vadd.f32 %v199_v32, %v656_v54  ;;  %vm669_vm6 = vcmp.lt.f32.partialorder %v447_v31, 8388608.0 }
  0xa8   :  { %v306_v41 = vmul.f32 0.03125, %v290_v33  ;;  %v437_v42 = vor.u32 %v436_v21, %v435_v34  ;;  %v307_v46 = vmul.f32 0.03125, %v291_v37  ;;  %v457_v49 = vcvt.f32.s32 %v247_v40 }
  0xa9   :  { %v445_v47 = vor.u32 %v444_v27, %v443_v38  ;;  %v451_v51 = vand.u32 2147483647, %v450_v43  ;;  %v455_v52 = vand.u32 2147483647, %v247_v40  ;;  %v232_v53 = vmax.f32 %v200_v44, 0.0 }
  0xaa   :  { %322 = vst [vmem:[#allocation5] sm:$0xff] %v306_v41  ;;  %v438_v50 = vsel %vm660_vm4, %v437_v42, %v244_v12  ;;  %v458_v59 = vcvt.s32.f32 %v457_v49  ;;  %v460_v60 = vand.u32 2147483648, %v247_v40  ;;  %v219_v1 = vadd.f32 %v218_v45, %v656_v54 }
  0xab   :  { %323 = vst [vmem:[#allocation5 + $0x8] sm:$0xff] %v307_v46  ;;  %v276_v57 = vmax.f32 %v438_v50, 0.0  ;;  %v446_v58 = vsel %vm664_vm5, %v445_v47, %v245_v13  ;;  %v453_v62 = vor.u32 %v452_v39, %v451_v51  ;;  %v248_v0 = vmul.f32 32.0, %v232_v53  ;;  %v202_v17 = vpop.f32.mrf.mxu2  ;;  %v221_v24 = vpop.f32.mrf.mxu3 }
  0xac   :  { %v277_v61 = vmax.f32 %v446_v58, 0.0  ;;  %v459_v3 = vand.u32 2147483647, %v458_v59  ;;  %v165_v4 = vadd.f32 %v164_v55, %v63_v63  ;;  %v184_v5 = vadd.f32 %v183_v56, %v63_v63  ;;  %v166_v48 = vpop.f32.mrf.mxu0  ;;  %v185_v59 = vpop.f32.mrf.mxu1 }
  0xad   :  { %v292_v2 = vmin.f32 %v276_v57, 255.0  ;;  %v454_v7 = vsel %vm669_vm6, %v453_v62, %v246_v15  ;;  %v465_v8 = vcvt.f32.s32 %v248_v0  ;;  %vm456_vm7 = vcmp.lt.f32.partialorder %v455_v52, 8388608.0  ;;  %v68_v57 = vpop.permute.xlu1 %67 }
  0xae   :  { %v293_v6 = vmin.f32 %v277_v61, 255.0  ;;  %v278_v10 = vmax.f32 %v454_v7, 0.0  ;;  %v461_v11 = vor.u32 %v460_v60, %v459_v3  ;;  %v463_v13 = vand.u32 2147483647, %v248_v0 }
  0xaf   :  { %v308_v9 = vmul.f32 0.03125, %v292_v2  ;;  %v466_v14 = vcvt.s32.f32 %v465_v8  ;;  %v233_v16 = vmax.f32 %v219_v1, 0.0  ;;  %v234_v19 = vmax.f32 %v165_v4, 0.0 }
  0xb0   :  { %v309_v12 = vmul.f32 0.03125, %v293_v6  ;;  %v294_v54 = vmin.f32 %v278_v10, 255.0  ;;  %v462_v18 = vsel %vm456_vm7, %v461_v11, %v247_v40  ;;  %v235_v20 = vmax.f32 %v184_v5, 0.0 }
  0xb1   :  { %324 = vst [vmem:[#allocation5 + $0x10] sm:$0xff] %v308_v9  ;;  %v279_v21 = vmax.f32 %v462_v18, 0.0  ;;  %v467_v22 = vand.u32 2147483647, %v466_v14  ;;  %v468_v23 = vand.u32 2147483648, %v248_v0  ;;  %v249_v15 = vmul.f32 32.0, %v233_v16 }
  0xb2   :  { %325 = vst [vmem:[#allocation5 + $0x18] sm:$0xff] %v309_v12  ;;  %v310_v25 = vmul.f32 0.03125, %v294_v54  ;;  %v250_v26 = vmul.f32 32.0, %v234_v19  ;;  %v251_v27 = vmul.f32 32.0, %v235_v20  ;;  %v203_v28 = vadd.f32 %v202_v17, %v63_v63 }
  0xb3   :  { %v295_v29 = vmin.f32 %v279_v21, 255.0  ;;  %v469_v30 = vor.u32 %v468_v23, %v467_v22  ;;  %v471_v31 = vand.u32 2147483647, %v249_v15  ;;  %v473_v32 = vcvt.f32.s32 %v249_v15  ;;  %v204_v20 = vpop.f32.mrf.mxu2 }
  0xb4   :  { %326 = vst [vmem:[#allocation5 + $0x20] sm:$0xff] %v310_v25  ;;  %vm464_vm8 = vcmp.lt.f32.partialorder %v463_v13, 8388608.0  ;;  %v479_v33 = vand.u32 2147483647, %v250_v26  ;;  %v481_v34 = vcvt.f32.s32 %v250_v26  ;;  %v222_v35 = vadd.f32 %v221_v24, %v63_v63  ;;  %v223_v24 = vpop.f32.mrf.mxu3 }
  0xb5   :  { %v311_v36 = vmul.f32 0.03125, %v295_v29  ;;  %v470_v37 = vsel %vm464_vm8, %v469_v30, %v248_v0  ;;  %v474_v38 = vcvt.s32.f32 %v473_v32  ;;  %v476_v39 = vand.u32 2147483648, %v249_v15 }
  0xb6   :  { %v280_v40 = vmax.f32 %v470_v37, 0.0  ;;  %vm680_vm9 = vcmp.lt.f32.partialorder %v471_v31, 8388608.0  ;;  %v482_v42 = vcvt.s32.f32 %v481_v34  ;;  %v484_v43 = vand.u32 2147483648, %v250_v26 }
  0xb7   :  { %327 = vst [vmem:[#allocation5 + $0x28] sm:$0xff] %v311_v36  ;;  %v475_v44 = vand.u32 2147483647, %v474_v38  ;;  %vm684_vm10 = vcmp.lt.f32.partialorder %v479_v33, 8388608.0  ;;  %v489_v46 = vcvt.f32.s32 %v251_v27  ;;  %v236_v47 = vmax.f32 %v203_v28, 0.0 }
  0xb8   :  { %v296_v49 = vmin.f32 %v280_v40, 255.0  ;;  %v483_v50 = vand.u32 2147483647, %v482_v42  ;;  %v487_v51 = vand.u32 2147483647, %v251_v27  ;;  %v237_v52 = vmax.f32 %v222_v35, 0.0 }
  0xb9   :  { %v477_v53 = vor.u32 %v476_v39, %v475_v44  ;;  %v490_v55 = vcvt.s32.f32 %v489_v46  ;;  %v492_v56 = vand.u32 2147483648, %v251_v27  ;;  %v252_v58 = vmul.f32 32.0, %v236_v47 }
  0xba   :  { %v312_v60 = vmul.f32 0.03125, %v296_v49  ;;  %v485_v61 = vor.u32 %v484_v43, %v483_v50  ;;  %v253_v62 = vmul.f32 32.0, %v237_v52  ;;  %v167_v63 = vadd.f32 %v166_v48, %v68_v57 }
  0xbb   :  { %v478_v0 = vsel %vm680_vm9, %v477_v53, %v249_v15  ;;  %v491_v1 = vand.u32 2147483647, %v490_v55  ;;  %v495_v2 = vand.u32 2147483647, %v252_v58  ;;  %v497_v3 = vcvt.f32.s32 %v252_v58 }
  0xbc   :  { %328 = vst [vmem:[#allocation5 + $0x30] sm:$0xff] %v312_v60  ;;  %v281_v4 = vmax.f32 %v478_v0, 0.0  ;;  %v486_v5 = vsel %vm684_vm10, %v485_v61, %v250_v26  ;;  %vm692_vm11 = vcmp.lt.f32.partialorder %v487_v51, 8388608.0  ;;  %v186_v7 = vadd.f32 %v185_v59, %v68_v57 }
  0xbd   :  { %v282_v8 = vmax.f32 %v486_v5, 0.0  ;;  %v493_v9 = vor.u32 %v492_v56, %v491_v1  ;;  %v498_v10 = vcvt.s32.f32 %v497_v3  ;;  %v500_v11 = vand.u32 2147483648, %v252_v58 }
  0xbe   :  { %v297_v12 = vmin.f32 %v281_v4, 255.0  ;;  %vm696_vm12 = vcmp.lt.f32.partialorder %v495_v2, 8388608.0  ;;  %v503_v14 = vand.u32 2147483647, %v253_v62  ;;  %v505_v16 = vcvt.f32.s32 %v253_v62 }
  0xbf   :  { %v298_v17 = vmin.f32 %v282_v8, 255.0  ;;  %v494_v54 = vsel %vm692_vm11, %v493_v9, %v251_v27  ;;  %v499_v18 = vand.u32 2147483647, %v498_v10  ;;  %v238_v19 = vmax.f32 %v167_v63, 0.0 }
  0xc0   :  { %v313_v21 = vmul.f32 0.03125, %v297_v12  ;;  %v283_v22 = vmax.f32 %v494_v54, 0.0  ;;  %v506_v23 = vcvt.s32.f32 %v505_v16  ;;  %v239_v15 = vmax.f32 %v186_v7, 0.0 }
  0xc1   :  { %v314_v25 = vmul.f32 0.03125, %v298_v17  ;;  %v501_v26 = vor.u32 %v500_v11, %v499_v18  ;;  %v508_v28 = vand.u32 2147483648, %v253_v62  ;;  %v254_v29 = vmul.f32 32.0, %v238_v19 }
  0xc2   :  { %329 = vst [vmem:[#allocation5 + $0x38] sm:$0xff] %v313_v21  ;;  %v299_v30 = vmin.f32 %v283_v22, 255.0  ;;  %v507_v31 = vand.u32 2147483647, %v506_v23  ;;  %v255_v32 = vmul.f32 32.0, %v239_v15  ;;  %v205_v33 = vadd.f32 %v204_v20, %v68_v57 }
  0xc3   :  { %330 = vst [vmem:[#allocation5 + $0x40] sm:$0xff] %v314_v25  ;;  %v502_v27 = vsel %vm696_vm12, %v501_v26, %v252_v58  ;;  %v513_v34 = vcvt.f32.s32 %v254_v29  ;;  %v224_v35 = vadd.f32 %v223_v24, %v68_v57  ;;  %vm504_vm13 = vcmp.lt.f32.partialorder %v503_v14, 8388608.0 }
  0xc4   :  { %v315_v36 = vmul.f32 0.03125, %v299_v30  ;;  %v284_v37 = vmax.f32 %v502_v27, 0.0  ;;  %v509_v38 = vor.u32 %v508_v28, %v507_v31  ;;  %v511_v39 = vand.u32 2147483647, %v254_v29 }
  0xc5   :  { %v514_v40 = vcvt.s32.f32 %v513_v34  ;;  %v521_v41 = vcvt.f32.s32 %v255_v32  ;;  %v516_v44 = vand.u32 2147483648, %v254_v29  ;;  %v240_v45 = vmax.f32 %v205_v33, 0.0 }
  0xc6   :  { %331 = vst [vmem:[#allocation5 + $0x48] sm:$0xff] %v315_v36  ;;  %v300_v42 = vmin.f32 %v284_v37, 255.0  ;;  %v510_v43 = vsel %vm504_vm13, %v509_v38, %v253_v62  ;;  %v241_v49 = vmax.f32 %v224_v35, 0.0  ;;  %v519_v51 = vand.u32 2147483647, %v255_v32 }
  0xc7   :  { %v285_v46 = vmax.f32 %v510_v43, 0.0  ;;  %v515_v47 = vand.u32 2147483647, %v514_v40  ;;  %v522_v48 = vcvt.s32.f32 %v521_v41  ;;  %v524_v52 = vand.u32 2147483648, %v255_v32 }
  0xc8   :  { %v316_v50 = vmul.f32 0.03125, %v300_v42  ;;  %v256_v53 = vmul.f32 32.0, %v240_v45  ;;  %v257_v58 = vmul.f32 32.0, %v241_v49  ;;  %vm512_vm14 = vcmp.lt.f32.partialorder %v511_v39, 8388608.0 }
  0xc9   :  { %v301_v55 = vmin.f32 %v285_v46, 255.0  ;;  %v517_v56 = vor.u32 %v516_v44, %v515_v47  ;;  %v523_v57 = vand.u32 2147483647, %v522_v48  ;;  %vm520_vm15 = vcmp.lt.f32.partialorder %v519_v51, 8388608.0 }
  0xca   :  { %332 = vst [vmem:[#allocation5 + $0x50] sm:$0xff] %v316_v50  ;;  %v529_v59 = vcvt.f32.s32 %v256_v53  ;;  %v537_v1 = vcvt.f32.s32 %v257_v58  ;;  %v527_v3 = vand.u32 2147483647, %v256_v53  ;;  %v532_v4 = vand.u32 2147483648, %v256_v53 }
  0xcb   :  { %v317_v60 = vmul.f32 0.03125, %v301_v55  ;;  %v518_v61 = vsel %vm512_vm14, %v517_v56, %v254_v29  ;;  %v525_v62 = vor.u32 %v524_v52, %v523_v57  ;;  %v535_v9 = vand.u32 2147483647, %v257_v58 }
  0xcc   :  { %v286_v63 = vmax.f32 %v518_v61, 0.0  ;;  %v530_v0 = vcvt.s32.f32 %v529_v59  ;;  %v538_v8 = vcvt.s32.f32 %v537_v1  ;;  %v540_v10 = vand.u32 2147483648, %v257_v58 }
  0xcd   :  { %333 = vst [vmem:[#allocation5 + $0x58] sm:$0xff] %v317_v60  ;;  %v526_v2 = vsel %vm520_vm15, %v525_v62, %v255_v32  ;;  %vm528_vm0 = vcmp.lt.f32.partialorder %v527_v3, 8388608.0  ;;  %vm536_vm1 = vcmp.lt.f32.partialorder %v535_v9, 8388608.0 }
  0xce   :  { %v302_v5 = vmin.f32 %v286_v63, 255.0  ;;  %v287_v6 = vmax.f32 %v526_v2, 0.0  ;;  %v531_v7 = vand.u32 2147483647, %v530_v0  ;;  %v539_v14 = vand.u32 2147483647, %v538_v8 }
  0xd0   :  { %v318_v11 = vmul.f32 0.03125, %v302_v5  ;;  %v303_v12 = vmin.f32 %v287_v6, 255.0  ;;  %v533_v13 = vor.u32 %v532_v4, %v531_v7  ;;  %v541_v54 = vor.u32 %v540_v10, %v539_v14 }
  0xd2   :  { %334 = vst [vmem:[#allocation5 + $0x60] sm:$0xff] %v318_v11  ;;  %v319_v16 = vmul.f32 0.03125, %v303_v12  ;;  %v534_v17 = vsel %vm528_vm0, %v533_v13, %v256_v53  ;;  %v542_v19 = vsel %vm536_vm1, %v541_v54, %v257_v58 }
  0xd3   :  { %v288_v18 = vmax.f32 %v534_v17, 0.0  ;;  %v289_v21 = vmax.f32 %v542_v19, 0.0 }
  0xd4   :  { %335 = vst [vmem:[#allocation5 + $0x68] sm:$0xff] %v319_v16 }
  0xd5   :  { %v304_v20 = vmin.f32 %v288_v18, 255.0  ;;  %v305_v23 = vmin.f32 %v289_v21, 255.0 }
  0xd7   :  { %v320_v22 = vmul.f32 0.03125, %v304_v20  ;;  %v321_v15 = vmul.f32 0.03125, %v305_v23 }
  0xd9   :  { %336 = vst [vmem:[#allocation5 + $0x70] sm:$0xff] %v320_v22 }
  0xda   :  { %337 = vst [vmem:[#allocation5 + $0x78] sm:$0xff] %v321_v15 }
  0xdb   :  { %350 = dma.vmem_to_hbm [thread:$0]  %s343_s2, 2048, %s345_s5, [#allocation4], %s609_s6, %s609_s6, %s610_s7  }
  0xdc   :  { %602 = dma.done.wait [#allocation4], 2048  }
  0xdd   :  { %603 = vsyncadd [#allocation4], 4294965248 }
  0xde   :  { %355 = vsyncpa [#allocation3], 1 }
  0xdf   :  { %356 = vsyncpa [#allocation4], 1 }

</bundles_post_ra>
